<compile_context>
chip_gen: v6e
topology: v6e:2x2x1
jax: 0.10.0
libtpu: 0.0.40
codegen_flags: <defaults>
</compile_context>

<pallas_src>
import jax
import jax.numpy as jnp
from jax.experimental import pallas as pl
from jax.experimental.pallas import tpu as pltpu


def _conv1x1_kernel(x_ref, w_ref, b_ref, o_ref):
    # x_ref: (TR, Cin_r), w_ref: (Cin_r, Cout_r), b_ref: (1, Cout_r) f32,
    # o_ref: (TR, Cout_r). W/b use constant index maps -> stay VMEM-resident.
    acc = jnp.dot(x_ref[...], w_ref[...], preferred_element_type=jnp.float32)
    o_ref[...] = (acc + b_ref[...]).astype(o_ref.dtype)


def _round_up(x, m):
    return (x + m - 1) // m * m


def conv_final_pallas(feats, weight, bias, *, tile_rows=4096, rep=8,
                      out_dtype=None):
    """feats: [N, Cin], weight: [Cin, Cout], bias: [Cout] -> [N, Cout].

    `tile_rows` counts rows of the reshaped [N/rep, rep*Cin] matrix, i.e. each
    grid step processes tile_rows*rep original points. rep=8 makes the output
    last dim 8*Cout = 128 lanes (unmasked lane-dense stores) for Cout=16.
    """
    N, Cin = feats.shape
    Cout = weight.shape[1]
    out_dtype = feats.dtype if out_dtype is None else out_dtype

    # Tiny remainder (N % rep points) is handled by plain XLA below.
    N_main = (N // rep) * rep
    if N_main == 0:
        return (feats @ weight + bias[None, :]).astype(out_dtype)

    # ---- 8-way block-diagonal weight replication (lane-dense reformulation) ----
    Cin_r, Cout_r = rep * Cin, rep * Cout
    w_rep = jnp.kron(jnp.eye(rep, dtype=weight.dtype), weight).astype(feats.dtype)
    b_rep = jnp.tile(bias, rep).reshape(1, Cout_r).astype(jnp.float32)

    # ---- lane-dense view of the rep-aligned prefix (bitcast when N % rep == 0) ----
    x_main = feats if N_main == N else feats[:N_main]
    nr = N_main // rep
    x = x_main.reshape(nr, Cin_r)

    # ---- tile selection: multiple of 8 (sublane rule), capped so the single
    # "parallel" axis has >= 2 steps (keeps both v7x TensorCores busy), capped
    # by the caller's tile_rows. Partial last block is masked by Pallas.
    tile_r = min(int(tile_rows), _round_up(-(-nr // 2), 8))
    tile_r = max(8, _round_up(tile_r, 8))
    n_steps = pl.cdiv(nr, tile_r)

    # ---- VMEM budget: set the scoped limit from the actual double-buffered
    # footprint so large tiles work on v5e (16 MiB default) while staying well
    # under v7x's 64 MiB physical VMEM.
    in_bytes = jnp.dtype(feats.dtype).itemsize
    out_bytes = jnp.dtype(out_dtype).itemsize
    tile_vmem = tile_r * Cin_r * in_bytes + tile_r * Cout_r * out_bytes
    weights_vmem = Cin_r * Cout_r * in_bytes + Cout_r * 4
    vmem_needed = 2 * tile_vmem + 2 * weights_vmem
    vmem_limit = int(min(max(vmem_needed + (2 << 20), 16 << 20), 48 << 20))

    # Advisory cost estimate so XLA can overlap neighboring HLO with this
    # long, bandwidth-bound custom call.
    cost = pl.CostEstimate(
        flops=2 * N_main * Cin * Cout,
        transcendentals=0,
        bytes_accessed=(N_main * (Cin * in_bytes + Cout * out_bytes)
                        + Cin_r * Cout_r * in_bytes + Cout_r * 4),
    )

    out = pl.pallas_call(
        _conv1x1_kernel,
        out_shape=jax.ShapeDtypeStruct((nr, Cout_r), out_dtype),
        grid_spec=pltpu.PrefetchScalarGridSpec(
            num_scalar_prefetch=0,
            grid=(n_steps,),
            in_specs=[
                pl.BlockSpec((tile_r, Cin_r), lambda i: (i, 0)),
                pl.BlockSpec((Cin_r, Cout_r), lambda i: (0, 0)),
                pl.BlockSpec((1, Cout_r), lambda i: (0, 0)),
            ],
            out_specs=pl.BlockSpec((tile_r, Cout_r), lambda i: (i, 0)),
        ),
        compiler_params=pltpu.CompilerParams(
            dimension_semantics=("parallel",),   # v7x: shard row loop over both TCs
            vmem_limit_bytes=vmem_limit,
        ),
        cost_estimate=cost,
    )(x, w_rep, b_rep)

    out_main = out.reshape(N_main, Cout)
    if N_main == N:
        return out_main

    # <= rep-1 leftover points: plain XLA, then concatenate.
    tail = (feats[N_main:] @ weight + bias[None, :]).astype(out_dtype)
    return jnp.concatenate([out_main, tail], axis=0)


def conv_final(feats, weight, bias, *, tile_rows=4096, min_pallas_rows=4096,
               out_dtype=None):
    """Dispatcher: for tiny N let XLA fuse feats @ W + b; otherwise Pallas."""
    out_dtype = feats.dtype if out_dtype is None else out_dtype
    if feats.shape[0] < min_pallas_rows:
        return (feats @ weight + bias[None, :]).astype(out_dtype)
    return conv_final_pallas(feats, weight, bias, tile_rows=tile_rows,
                             out_dtype=out_dtype)


if __name__ == "__main__":
    # Small shapes consistent with the module: inplanes=32, planes=16.
    inplanes, planes = 32, 16

    key = jax.random.PRNGKey(0)
    kx, kw, kb = jax.random.split(key, 3)

    # Deterministic synthetic parameters (not a checkpoint).
    weight = jax.random.normal(kw, (inplanes, planes), dtype=jnp.float32) * 0.05
    bias = jax.random.normal(kb, (planes,), dtype=jnp.float32) * 0.01

    # Case 1: N multiple of 8; default tile caps at ceil(nr/2) -> 2 grid steps.
    N1 = 256
    feats1 = jax.random.normal(kx, (N1, inplanes), dtype=jnp.float32)
    out1 = jax.block_until_ready(conv_final_pallas(feats1, weight, bias))
    ref1 = feats1 @ weight + bias[None, :]
    assert out1.shape == (N1, planes)
    assert jnp.allclose(out1, ref1, atol=1e-4, rtol=1e-4)

    # Case 2: ragged N (not a multiple of 8) with a small explicit tile ->
    # multi-step grid, masked partial last block, XLA tail + concatenate.
    N2 = 1003
    feats2 = jax.random.normal(jax.random.fold_in(kx, 1), (N2, inplanes),
                               dtype=jnp.float32)
    out2 = jax.block_until_ready(
        conv_final_pallas(feats2, weight, bias, tile_rows=64))
    ref2 = feats2 @ weight + bias[None, :]
    assert out2.shape == (N2, planes)
    assert jnp.allclose(out2, ref2, atol=1e-4, rtol=1e-4)

    # Case 3: non-multiple-of-8 tile_rows is rounded up (robustness) and a
    # bf16-in / bf16-out run (f32 accumulation inside the kernel).
    N3 = 512
    feats3 = jax.random.normal(jax.random.fold_in(kx, 2), (N3, inplanes),
                               dtype=jnp.float32)
    out3 = jax.block_until_ready(
        conv_final_pallas(feats3, weight, bias, tile_rows=50))
    ref3 = feats3 @ weight + bias[None, :]
    assert out3.shape == (N3, planes)
    assert jnp.allclose(out3, ref3, atol=1e-4, rtol=1e-4)

    feats3_bf16 = feats3.astype(jnp.bfloat16)   # producer already emits bf16
    out3_bf16 = jax.block_until_ready(
        conv_final_pallas(feats3_bf16, weight, bias, out_dtype=jnp.bfloat16))
    assert out3_bf16.dtype == jnp.bfloat16 and out3_bf16.shape == (N3, planes)
    assert jnp.allclose(out3_bf16.astype(jnp.float32), ref3, atol=5e-2, rtol=5e-2)

    # Case 4: tiny-N dispatcher fallback path.
    out4 = jax.block_until_ready(conv_final(feats1[:37], weight, bias))
    assert jnp.allclose(out4, feats1[:37] @ weight + bias[None, :],
                        atol=1e-4, rtol=1e-4)

    # TODO(synk): sparse coordinate bookkeeping (CoordinateManager) has no
    # compute content for kernel_size=1/stride=1 and is passed through unchanged.

    print("KERNEL_OK")
</pallas_src>

<mosaic_0001>
module attributes {stable_mosaic.version = 11 : i64} {
  func.func @_conv1x1_kernel(%arg0: i32, %arg1: memref<16x256xf32, #tpu.memory_space<vmem>>, %arg2: memref<256x128xf32, #tpu.memory_space<vmem>>, %arg3: memref<1x128xf32, #tpu.memory_space<vmem>>, %arg4: memref<16x128xf32, #tpu.memory_space<vmem>>) attributes {dimension_semantics = [#tpu.dimension_semantics<parallel>], iteration_bounds = array<i64: 2>, scalar_prefetch = 0 : i64, scratch_operands = 0 : i64, tpu.core_type = #tpu.core_type<tc>, window_params = [{transform_indices = @transform_0, window_bounds = array<i64: 16, 256>}, {pipeline_mode = #tpu.pipeline_mode<synchronous>, transform_indices = @transform_1, window_bounds = array<i64: 256, 128>}, {pipeline_mode = #tpu.pipeline_mode<synchronous>, transform_indices = @transform_2, window_bounds = array<i64: 1, 128>}, {transform_indices = @transform_3, window_bounds = array<i64: 16, 128>}]} {
    %c0 = arith.constant 0 : index
    %c0_0 = arith.constant 0 : index
    %0 = vector.load %arg1[%c0, %c0_0] : memref<16x256xf32, #tpu.memory_space<vmem>>, vector<16x256xf32>
    %c0_1 = arith.constant 0 : index
    %c0_2 = arith.constant 0 : index
    %1 = vector.load %arg2[%c0_1, %c0_2] : memref<256x128xf32, #tpu.memory_space<vmem>>, vector<256x128xf32>
    %cst = arith.constant dense<0.000000e+00> : vector<16x128xf32>
    %2 = tpu.matmul %0, %1, %cst {dimension_numbers = #tpu.dot_dimension_numbers<[1], [0], [0], [1], [0, 0, 1, 1], [], []>} : vector<16x256xf32>, vector<256x128xf32>, vector<16x128xf32> -> vector<16x128xf32>
    %c0_3 = arith.constant 0 : index
    %c0_4 = arith.constant 0 : index
    %3 = vector.load %arg3[%c0_3, %c0_4] : memref<1x128xf32, #tpu.memory_space<vmem>>, vector<1x128xf32>
    %4 = vector.broadcast %3 : vector<1x128xf32> to vector<16x128xf32>
    %5 = arith.addf %2, %4 : vector<16x128xf32>
    %c0_5 = arith.constant 0 : index
    %c0_6 = arith.constant 0 : index
    %6 = vector.load %arg4[%c0_5, %c0_6] : memref<16x128xf32, #tpu.memory_space<vmem>>, vector<16x128xf32>
    tpu.vector_store %arg4[%c0_5, %c0_6], %5 {strides = array<i32>} : memref<16x128xf32, #tpu.memory_space<vmem>>, vector<16x128xf32>,
    return
  }
  func.func @transform_0(%arg0: i32) -> (i32, i32) {
    %c0_i32 = arith.constant 0 : i32
    %c0_i32_0 = arith.constant 0 : i32
    return %arg0, %c0_i32 : i32, i32
  }
  func.func @transform_1(%arg0: i32) -> (i32, i32) {
    %c0_i32 = arith.constant 0 : i32
    %c0_i32_0 = arith.constant 0 : i32
    %c0_i32_1 = arith.constant 0 : i32
    return %c0_i32, %c0_i32_0 : i32, i32
  }
  func.func @transform_2(%arg0: i32) -> (i32, i32) {
    %c0_i32 = arith.constant 0 : i32
    %c0_i32_0 = arith.constant 0 : i32
    %c0_i32_1 = arith.constant 0 : i32
    return %c0_i32, %c0_i32_0 : i32, i32
  }
  func.func @transform_3(%arg0: i32) -> (i32, i32) {
    %c0_i32 = arith.constant 0 : i32
    %c0_i32_0 = arith.constant 0 : i32
    return %arg0, %c0_i32 : i32, i32
  }
}

</mosaic_0001>

<bundles_post_ra>
// kernel: tpu_custom_call.1
= control target key start
LH: loop header
LB: loop body
LE: loop exit
PB: predicated region body
PF: predicated region fallthrough
CT: control target
= control target key end

     0   :  { %8 = vsyncpa [#allocation3], 0  ;;  %s918_s0 = inlined_call_operand.hbm [shape: f32[32,256], index: 0, kind: input, shape index: {}]   ;;  %s919_s1 = inlined_call_operand.hbm [shape: f32[256,128], index: 1, kind: input, shape index: {}]   ;;  %s920_s2 = inlined_call_operand.vmem [shape: f32[1,128], index: 2, kind: input, shape index: {}]   ;;  %s921_s3 = inlined_call_operand.hbm [shape: f32[32,128], index: 3, kind: output, shape index: {}]  }
   0x1   :  { %10 = vsyncpa [#allocation3 + $0x1], 0 }
   0x2   :  { %11 = vsyncpa [#allocation6], 0 }
   0x3   :  { %12 = vsyncpa [#allocation4], 0 }
   0x4   :  { %14 = vsyncpa [#allocation4 + $0x1], 0  ;;  %s731_s12 = smov 0   ;;  %s733_s13 = smov 0  }
   0x5   :  { %s735_s14 = smov 0   ;;  %s737_s15 = smov 0  }
   0x6 LB: > { %s752_s16 = sadd.s32 4294967295, %s700_s15   ;;  %s424_s17 = sadd.s32 4294967294, %s700_s15   ;;  %s700_s15 = sphi %s737_s15, %s943_s15   ;;  %s696_s14 = sphi %s735_s14, %s942_s14   ;;  %s692_s13 = sphi %s733_s13, %s941_s13   ;;  %s688_s12 = sphi %s731_s12, %s940_s12  }
   0x7   : > { %p40_p0 = scmp.ne.s32.totalorder %s692_s13, %s688_s12  ;;  %p922_p1 = scmp.eq.s32.totalorder %s752_s16, 0 }
   0x8   : > { %p112_p3 = scmp.eq.s32.totalorder %s424_s17, 1  ;;  %p425_p5 = scmp.ge.s32.totalorder %s700_s15, 1 }
   0x9   : > { %p761_p4 = por %p922_p1, %p40_p0  ;;  %p119_p7 = scmp.lt.s32.totalorder %s700_s15, 3 }
   0xa   : > { %p766_p6 = por %p112_p3, %p40_p0  ;;  %s702_s21 = smov [#allocation5]  }
   0xb   : > { %s926_s18 = scalar_select %p761_p4, 1, 0 }
   0xc   : > { %s927_s19 = scalar_select %p766_p6, 1, 0 }
   0xd   : > { %p771_p8 = pnand %p425_p5, %p119_p7  ;;  %s131_s22 = sshll.u32 %s702_s21, 4  ;;  %s132_s22 = int_to_ptr.vmem [resolvable:$true] %s131_s22 }
   0xe   : > { %s785_s24 = sadd.s32 1, %s700_s15   ;;  %s27_s25 = sadd.s32 1, %s696_s14 }
   0xf   : > { %s928_s20 = scalar_select %p771_p8, 1, 0 }
  0x10   : > { %p523_p9 = pneg %p771_p8  ;;  %s24_s26 = ssub.s32 %s700_s15, %s785_s24 }
  0x11   : > { %s589_s27 = scalar_lea.vmem %s132_s22, 4096  ;;  %p597_p5 = scmp.lt.s32.totalorder %s132_s22, %s132_s22 }
  0x12   : > { %p780_p11 = pnand %p523_p9, %p922_p1  ;;  %p590_p13 = scmp.ne.s32.totalorder %s132_s22, %s589_s27 }
  0x13   : > { %p598_p7 = scmp.lt.s32.totalorder %s589_s27, %s589_s27 }
  0x14   : > { %p580_p12 = pneg %p780_p11 }
  0x15   : > { %p599_p10 = por %p598_p7, %p597_p5 }
  0x16   : > { %p592_p0 = pnand %p590_p13, %p580_p12 }
  0x18   : > { %p593_p3 = pneg %p592_p0 }
  0x1a   : > { %p600_p2 = pnand %p599_p10, %p593_p3 }
  0x1c   : > { %603 = shalt.err (!%p600_p2)
}
  0x1d   : > { %s703_s28 = smov 128   ;;  %s704_s29 = smov 8  }
  0x1e   : > { %526 = dma.hbm_to_vmem [thread:$0]  (!%p780_p11), %s919_s1, 4096, %s132_s22, [#allocation6], %s703_s28, %s703_s28, %s704_s29  }
  0x1f   : > { %p25_p9 = scmp.eq.s32.totalorder %s24_s26, 0  ;;  %p34_p12 = scmp.ne.s32.totalorder %s696_s14, %s692_s13 }
  0x20   : > { %p35_p10 = scmp.eq.s32.totalorder %s700_s15, 0  ;;  %p536_p2 = scmp.lt.s32.totalorder %s700_s15, 2 }
  0x21   : > { %s802_s5 = scalar_select %p25_p9, %s696_s14, %s27_s25  }
  0x22   : > { %p36_p13 = por %p35_p10, %p34_p12  ;;  %p930_p0 = scmp.eq.s32.totalorder %s752_s16, 1 }
  0x23   : > { %s148_s7 = sand.u32 1, %s696_s14   ;;  %s443_s8 = sshll.u32 %s700_s15, 9 }
  0x24   : > { %p806_p3 = por %p930_p0, %p34_p12  ;;  %s428_s9 = sshll.u32 %s148_s7, 5 }
  0x25   : > { %s815_s17 = scalar_lea.hbm %s918_s0, %s443_s8  ;;  %s152_s21 = scalar_lea.vmem [#allocation2], %s428_s9 }
  0x26   : > { %s931_s6 = scalar_select %p806_p3, 1, 0 }
  0x27   : > { %s160_s22 = sshll.u32 %s152_s21, 4  ;;  %p817_p11 = pnand %p536_p2, %p36_p13  ;;  %s821_s22 = int_to_ptr.vmem [resolvable:$true] %s160_s22 }
  0x28   : > { %s823_s25 = scalar_lea.sflag [#allocation3], %s148_s7  ;;  %s604_s26 = scalar_lea.hbm %s815_s17, 512 }
  0x29   : > { %p605_p5 = scmp.ne.s32.totalorder %s815_s17, %s604_s26  ;;  %p606_p7 = pneg %p817_p11 }
  0x2a   : > { %s609_s29 = scalar_lea.hbm %s918_s0, 1024  ;;  %p610_p10 = scmp.lt.s32.totalorder %s815_s17, %s918_s0 }
  0x2b   : > { %p607_p9 = pnand %p606_p7, %p605_p5  ;;  %p611_p2 = scmp.lt.s32.totalorder %s609_s29, %s604_s26 }
  0x2d   : > { %p608_p12 = pneg %p607_p9  ;;  %p612_p13 = por %p611_p2, %p610_p10 }
  0x2f   : > { %p613_p0 = pnand %p612_p13, %p608_p12 }
  0x31   : > { %616 = shalt.err (!%p613_p0)
}
  0x32   : > { %s617_s7 = scalar_lea.vmem %s821_s22, 512  ;;  %s705_s8 = smov [#allocation2]  }
  0x33   : > { %p618_p1 = scmp.ne.s32.totalorder %s821_s22, %s617_s7  ;;  %s622_s9 = sshll.u32 %s705_s8, 4  ;;  %s623_s9 = int_to_ptr.vmem [resolvable:$false] %s622_s9 }
  0x34   : > { %s624_s10 = scalar_lea.vmem %s623_s9, 1024  ;;  %p625_p9 = scmp.lt.s32.totalorder %s821_s22, %s623_s9 }
  0x35   : > { %p620_p6 = pnand %p618_p1, %p606_p7  ;;  %p626_p3 = scmp.lt.s32.totalorder %s624_s10, %s617_s7 }
  0x37   : > { %p621_p5 = pneg %p620_p6  ;;  %p627_p4 = por %p626_p3, %p625_p9 }
  0x39   : > { %p628_p8 = pnand %p627_p4, %p621_p5 }
  0x3b   : > { %631 = shalt.err (!%p628_p8)
}
  0x3c   : > { %s706_s11 = smov 256   ;;  %s707_s21 = smov 16  }
  0x3d   : > { %530 = dma.hbm_to_vmem [thread:$0]  (!%p817_p11), %s815_s17, 512, %s821_s22, %s823_s25, %s706_s11, %s706_s11, %s707_s21  }
  0x3e   : > { %p933_p1 = scmp.ne.s32.totalorder %s928_s20, 0 }
  0x3f   : > { %s847_s26 = sand.u32 (!%p933_p1), 1, %s692_s13   ;;  %p934_p4 = scmp.ne.s32.totalorder (!%p933_p1), %s926_s18, 0 }
  0x40   : > { %172 = sbr.rel (%p933_p1) target bundleno = 320 (0x140), region = 32  ;;  %s433_s27 = sshll.u32 (!%p933_p1), %s847_s26, 5 }
  0x41   : > { %s175_s28 = scalar_lea.sflag (!%p933_p1), [#allocation3], %s847_s26  ;;  %s851_s29 = scalar_lea.vmem (!%p933_p1), [#allocation2], %s433_s27 }
  0x45   : > { %675 = dma.done.wait (%p934_p4), %s175_s28, 512  }
  0x46   : > { %677 = vsyncadd (%p934_p4), %s175_s28, 4294966784  ;;  %p935_p6 = scmp.eq.s32.totalorder %s752_s16, 0 }
  0x48   : > { %679 = dma.done.wait (%p935_p6), [#allocation6], 4096   ;;  %p936_p8 = pmov %p935_p6 }
  0x49   : > { %v242_v0 = vld [vmem:[#allocation5 + $0xf8] sm:$0xff]  ;;  %v241_v2 = vld [vmem:[#allocation5 + $0xf0] sm:$0xff]  ;;  %v240_v4 = vld [vmem:[#allocation5 + $0xe8] sm:$0xff]  ;;  %s435_s18 = sshll.u32 %s847_s26, 4  ;;  %s444_s22 = sshll.u32 %s752_s16, 8 }
  0x4a   : > { %681 = vsyncadd (%p936_p8), [#allocation6], 4294963200  ;;  %v226_v1 = vld [vmem:[#allocation5 + $0x78] sm:$0xff]  ;;  %445 = vmatprep.subr.mxu0 %v242_v0  ;;  %483 = vmatprep.subr.mxu1 %v242_v0  ;;  %v225_v3 = vld [vmem:[#allocation5 + $0x70] sm:$0xff]  ;;  %s204_s20 = scalar_lea.vmem [#allocation7], %s435_s18  ;;  %s875_s7 = scalar_lea.hbm %s921_s3, %s444_s22 }
  0x4b   : > { %446 = vmatpush3.msra.mxu0 %v226_v1  ;;  %499 = vmatpush3.msra.mxu1 %v226_v1  ;;  %v224_v5 = vld [vmem:[#allocation5 + $0x68] sm:$0xff]  ;;  %v239_v6 = vld [vmem:[#allocation5 + $0xe0] sm:$0xff]  ;;  %v238_v8 = vld [vmem:[#allocation5 + $0xd8] sm:$0xff]  ;;  %s341_s17 = sshll.u32 %s204_s20, 4  ;;  %s328_s16 = scalar_lea.sflag [#allocation4], %s847_s26  ;;  %s870_s17 = int_to_ptr.vmem [resolvable:$true] %s341_s17 }
  0x4c   : > { %447 = vmatprep.subr.mxu0 %v241_v2  ;;  %484 = vmatprep.subr.mxu1 %v241_v2  ;;  %v223_v7 = vld [vmem:[#allocation5 + $0x60] sm:$0xff]  ;;  %v222_v9 = vld [vmem:[#allocation5 + $0x58] sm:$0xff]  ;;  %v237_v10 = vld [vmem:[#allocation5 + $0xd0] sm:$0xff]  ;;  %s632_s8 = scalar_lea.vmem %s870_s17, 256  ;;  %p937_p11 = scmp.ne.s32.totalorder %s931_s6, 0 }
  0x4d   : > { %448 = vmatpush3.msra.mxu0 %v225_v3  ;;  %500 = vmatpush3.msra.mxu1 %v225_v3  ;;  %v221_v11 = vld [vmem:[#allocation5 + $0x50] sm:$0xff]  ;;  %v236_v12 = vld [vmem:[#allocation5 + $0xc8] sm:$0xff]  ;;  %v235_v14 = vld [vmem:[#allocation5 + $0xc0] sm:$0xff]  ;;  %p633_p3 = scmp.ne.s32.totalorder %s870_s17, %s632_s8  ;;  %s708_s9 = smov [#allocation7]  }
  0x4e   : > { %449 = vmatprep.subr.mxu0 %v240_v4  ;;  %485 = vmatprep.subr.mxu1 %v240_v4  ;;  %v220_v13 = vld [vmem:[#allocation5 + $0x48] sm:$0xff]  ;;  %v219_v15 = vld [vmem:[#allocation5 + $0x40] sm:$0xff]  ;;  %v234_v16 = vld [vmem:[#allocation5 + $0xb8] sm:$0xff]  ;;  %s636_s10 = sshll.u32 %s708_s9, 4  ;;  %s637_s10 = int_to_ptr.vmem [resolvable:$false] %s636_s10 }
  0x4f   : > { %450 = vmatpush3.msra.mxu0 %v224_v5  ;;  %501 = vmatpush3.msra.mxu1 %v224_v5  ;;  %v218_v17 = vld [vmem:[#allocation5 + $0x38] sm:$0xff]  ;;  %v233_v18 = vld [vmem:[#allocation5 + $0xb0] sm:$0xff]  ;;  %v232_v20 = vld [vmem:[#allocation5 + $0xa8] sm:$0xff]  ;;  %p634_p7 = pnand %p633_p3, %p937_p11  ;;  %s638_s11 = scalar_lea.vmem %s637_s10, 512 }
  0x50   : > { %451 = vmatprep.subr.mxu0 %v239_v6  ;;  %486 = vmatprep.subr.mxu1 %v239_v6  ;;  %v217_v19 = vld [vmem:[#allocation5 + $0x30] sm:$0xff]  ;;  %v216_v21 = vld [vmem:[#allocation5 + $0x28] sm:$0xff]  ;;  %v231_v22 = vld [vmem:[#allocation5 + $0xa0] sm:$0xff]  ;;  %p639_p10 = scmp.lt.s32.totalorder %s870_s17, %s637_s10  ;;  %p640_p2 = scmp.lt.s32.totalorder %s638_s11, %s632_s8 }
  0x51   : > { %452 = vmatpush3.msra.mxu0 %v223_v7  ;;  %502 = vmatpush3.msra.mxu1 %v223_v7  ;;  %v215_v23 = vld [vmem:[#allocation5 + $0x20] sm:$0xff]  ;;  %v230_v24 = vld [vmem:[#allocation5 + $0x98] sm:$0xff]  ;;  %v229_v26 = vld [vmem:[#allocation5 + $0x90] sm:$0xff]  ;;  %p635_p12 = pneg %p634_p7 }
  0x52   : > { %453 = vmatprep.subr.mxu0 %v238_v8  ;;  %487 = vmatprep.subr.mxu1 %v238_v8  ;;  %v214_v25 = vld [vmem:[#allocation5 + $0x18] sm:$0xff]  ;;  %v213_v27 = vld [vmem:[#allocation5 + $0x10] sm:$0xff]  ;;  %v228_v28 = vld [vmem:[#allocation5 + $0x88] sm:$0xff]  ;;  %p641_p13 = por %p640_p2, %p639_p10 }
  0x53   : > { %454 = vmatpush3.msra.mxu0 %v222_v9  ;;  %503 = vmatpush3.msra.mxu1 %v222_v9  ;;  %v212_v29 = vld [vmem:[#allocation5 + $0x8] sm:$0xff]  ;;  %v227_v30 = vld [vmem:[#allocation5 + $0x80] sm:$0xff]  ;;  %v210_v33 = vld [vmem:[%s851_s29 + $0x18] sm:$0xff] }
  0x54   : > { %455 = vmatprep.subr.mxu0 %v237_v10  ;;  %488 = vmatprep.subr.mxu1 %v237_v10  ;;  %v211_v31 = vld [vmem:[#allocation5] sm:$0xff]  ;;  %v208_v32 = vld [vmem:[%s851_s29 + $0x8] sm:$0xff]  ;;  %v209_v35 = vld [vmem:[%s851_s29 + $0x10] sm:$0xff]  ;;  %p642_p0 = pnand %p641_p13, %p635_p12 }
  0x55   : > { %456 = vmatpush3.msra.mxu0 %v221_v11  ;;  %504 = vmatpush3.msra.mxu1 %v221_v11  ;;  %v207_v34 = vld [vmem:[%s851_s29] sm:$0xff] }
  0x56   : > { %457 = vmatprep.subr.mxu0 %v236_v12  ;;  %489 = vmatprep.subr.mxu1 %v236_v12  ;;  %v436_v38 = vld [vmem:[%s920_s2] ss:$0 sm:$0xff] }
  0x57   : > { %458 = vmatpush3.msra.mxu0 %v220_v13  ;;  %505 = vmatpush3.msra.mxu1 %v220_v13 }
  0x58   : > { %459 = vmatprep.subr.mxu0 %v235_v14  ;;  %490 = vmatprep.subr.mxu1 %v235_v14 }
  0x59   : > { %460 = vmatpush3.msra.mxu0 %v219_v15  ;;  %506 = vmatpush3.msra.mxu1 %v219_v15 }
  0x5a   : > { %461 = vmatprep.subr.mxu0 %v234_v16  ;;  %491 = vmatprep.subr.mxu1 %v234_v16 }
  0x5b   : > { %462 = vmatpush3.msra.mxu0 %v218_v17  ;;  %507 = vmatpush3.msra.mxu1 %v218_v17 }
  0x5c   : > { %463 = vmatprep.subr.mxu0 %v233_v18  ;;  %492 = vmatprep.subr.mxu1 %v233_v18 }
  0x5d   : > { %464 = vmatpush3.msra.mxu0 %v217_v19  ;;  %508 = vmatpush3.msra.mxu1 %v217_v19 }
  0x5e   : > { %465 = vmatprep.subr.mxu0 %v232_v20  ;;  %493 = vmatprep.subr.mxu1 %v232_v20 }
  0x5f   : > { %466 = vmatpush3.msra.mxu0 %v216_v21  ;;  %509 = vmatpush3.msra.mxu1 %v216_v21 }
  0x60   : > { %467 = vmatprep.subr.mxu0 %v231_v22  ;;  %494 = vmatprep.subr.mxu1 %v231_v22 }
  0x61   : > { %468 = vmatpush3.msra.mxu0 %v215_v23  ;;  %510 = vmatpush3.msra.mxu1 %v215_v23 }
  0x62   : > { %469 = vmatprep.subr.mxu0 %v230_v24  ;;  %495 = vmatprep.subr.mxu1 %v230_v24 }
  0x63   : > { %470 = vmatpush3.msra.mxu0 %v214_v25  ;;  %511 = vmatpush3.msra.mxu1 %v214_v25 }
  0x64   : > { %471 = vmatprep.subr.mxu0 %v229_v26  ;;  %496 = vmatprep.subr.mxu1 %v229_v26 }
  0x65   : > { %472 = vmatpush3.msra.mxu0 %v213_v27  ;;  %512 = vmatpush3.msra.mxu1 %v213_v27 }
  0x66   : > { %473 = vmatprep.subr.mxu0 %v228_v28  ;;  %497 = vmatprep.subr.mxu1 %v228_v28 }
  0x67   : > { %474 = vmatpush3.msra.mxu0 %v212_v29  ;;  %513 = vmatpush3.msra.mxu1 %v212_v29 }
  0x68   : > { %475 = vmatprep.subr.mxu0 %v227_v30  ;;  %498 = vmatprep.subr.mxu1 %v227_v30 }
  0x69   : > { %476 = vmatpush3.msra.mxu0 %v211_v31  ;;  %514 = vmatpush3.msra.mxu1 %v211_v31 }
  0x6a   : > { %314 = vmatprep.mubr.f32.mxu0 %v208_v32  ;;  %319 = vmatprep.mubr.f32.mxu1 %v210_v33 }
  0x6b   : > { %315 = vmatmul.mubr.f32.vlgmr.msra.gmra.mxu0 %v207_v34  ;;  %320 = vmatmul.mubr.f32.vlgmr.msra.gmra.mxu1 %v209_v35 }
 0x12b   : > { %v477_v36 = vpop.f32.mrf.mxu0  ;;  %v480_v37 = vpop.f32.mrf.mxu1 }
 0x12d   : > { %v478_v39 = vpop.f32.mrf.mxu0  ;;  %v481_v40 = vpop.f32.mrf.mxu1 }
 0x12e   : > { %v479_v41 = vadd.f32 %v478_v39, %v477_v36  ;;  %v482_v42 = vadd.f32 %v481_v40, %v480_v37 }
 0x130   : > { %v317_v43 = vadd.f32 %v479_v41, %v436_v38  ;;  %v322_v44 = vadd.f32 %v482_v42, %v436_v38 }
 0x132   : > { %325 = vst [vmem:[%s204_s20] sm:$0xff] %v317_v43  ;;  %326 = vst [vmem:[%s204_s20 + $0x8] sm:$0xff] %v322_v44 }
 0x133   : > { %645 = shalt.err (!%p642_p0)
}
 0x134   : > { %s646_s21 = scalar_lea.hbm %s875_s7, 256  ;;  %s650_s29 = scalar_lea.hbm %s921_s3, 512 }
 0x135   : > { %p647_p5 = scmp.ne.s32.totalorder %s875_s7, %s646_s21  ;;  %p651_p4 = scmp.lt.s32.totalorder %s875_s7, %s921_s3 }
 0x136   : > { %p652_p6 = scmp.lt.s32.totalorder %s650_s29, %s646_s21 }
 0x137   : > { %p648_p9 = pnand %p647_p5, %p937_p11 }
 0x138   : > { %p653_p8 = por %p652_p6, %p651_p4 }
 0x139   : > { %p649_p1 = pneg %p648_p9 }
 0x13b   : > { %p654_p3 = pnand %p653_p8, %p649_p1 }
 0x13d   : > { %657 = shalt.err (!%p654_p3)
}
 0x13e   : > { %s709_s22 = smov 128   ;;  %s710_s23 = smov 8  }
 0x13f   : > { %521 = dma.vmem_to_hbm [thread:$0]  (%p937_p11), %s870_s17, 256, %s875_s7, %s328_s16, %s709_s22, %s709_s22, %s710_s23  }
 0x140 PF: > { %s356_s25 = sand.u32 1, %s688_s12   ;;  %p938_p7 = scmp.ne.s32.totalorder %s927_s19, 0 }
 0x141   : > { %p939_p12 = scmp.ge.s32.totalorder %s700_s15, 2  ;;  %s357_s30 = scalar_lea.sflag [#allocation4], %s356_s25 }
 0x143   : > { %p532_p10 = pnand %p939_p12, %p938_p7 }
 0x145   : > { %p533_p2 = pneg %p532_p10 }
 0x147   : > { %683 = dma.done.wait (%p533_p2), %s357_s30, 256  }
 0x148   : > { %685 = vsyncadd (%p533_p2), %s357_s30, 4294967040  ;;  %p17_p13 = scmp.ge.s32.totalorder %s785_s24, 4   ;;  %s940_s12 = smov %s692_s13 }
 0x149   : > { %s941_s13 = smov %s696_s14  ;;  %s942_s14 = smov %s802_s5 }
 0x14a   : > { %s943_s15 = smov %s785_s24  ;;  %19 = sbr.rel (!%p17_p13) target bundleno = 6 (0x6), region = 81 }
 0x14f   :  { %362 = vsyncpa [#allocation3], 1 }
 0x150   :  { %364 = vsyncpa [#allocation3 + $0x1], 1 }
 0x151   :  { %365 = vsyncpa [#allocation6], 1 }
 0x152   :  { %366 = vsyncpa [#allocation4], 1 }
 0x153   :  { %368 = vsyncpa [#allocation4 + $0x1], 1 }

</bundles_post_ra>
